<compile_context>
chip_gen: v7x
topology: tpu7x:2x2x1
jax: 0.10.0
libtpu: 0.0.40
codegen_flags: <defaults>
</compile_context>

<pallas_src>
import functools

import jax
import jax.numpy as jnp
from jax import lax
from jax.experimental import pallas as pl
from jax.experimental.pallas import tpu as pltpu

EPS = 1e-5   # PyTorch InstanceNorm2d default eps
KSIZE = 3


def _round_up(x, m):
    return (x + m - 1) // m * m


def _unet_block_kernel(x_ref, w1_ref, w2_ref, o_ref, xe_ref, col_ref,
                       *, H, W, M, Cin_p, Cmid_p):
    """One batch element: (conv3x3 + InstanceNorm + ReLU) twice, fused.

    x_ref:   (1, Cin_p, L)       input image, channels on sublanes, H*W on lanes
    w1_ref:  (Cmid_p, 9*Cin_p)   im2col weight matrix, tap-major / channel-minor
    w2_ref:  (Cout_p, 9*Cmid_p)
    o_ref:   (1, Cout_p, L)
    xe_ref:  (Cmax_p, L + 2*M)   shared zero-margin buffer (both stages)
    col_ref: (9*Cmax_p, L)       shared im2col scratch (both stages)
    """
    L = H * W
    Cmax_p = xe_ref.shape[0]

    # Horizontal-validity masks for the dx = +-1 taps.  Built once per kernel
    # invocation, reused by both stages.  Vertical (dy) out-of-image reads are
    # handled for free by the zero margins (M >= W + 1), so no hh masks needed.
    ww = lax.broadcasted_iota(jnp.int32, (1, L), 1) % W
    mask_left = ww >= 1            # positions where a dx = -1 tap is in-image
    mask_right = ww < (W - 1)      # positions where a dx = +1 tap is in-image

    # Zero only the two halo margin strips; the interior is fully overwritten
    # by each stage's activation store, so zeroing it would be wasted vst.
    zeros_margin = jnp.zeros((Cmax_p, M), jnp.float32)
    xe_ref[:, pl.ds(0, M)] = zeros_margin
    xe_ref[:, pl.ds(M + L, M)] = zeros_margin

    def stage(v, w_mat, cp):
        # v: (cp, L) activations, w_mat: (Co_p, 9*cp).  Returns (Co_p, L).
        xe_ref[pl.ds(0, cp), pl.ds(M, L)] = v      # M is 128-aligned store

        # Build im2col (9*cp, L): each tap is a lane-shifted view of the image
        # (shift by dy*W + dx on the flattened axis); only horizontal wrap
        # needs masking, vertical overflow reads the zero margins.
        # TODO(synk): the 8 non-center tap loads are lane-unaligned; if
        # profiling shows vld/XLU binding, derive dx=+-1 taps with pltpu.roll
        # or pad W to a multiple of 128 at production sizes.
        for ky in range(KSIZE):
            for kx in range(KSIZE):
                dy, dx = ky - 1, kx - 1
                tap = xe_ref[pl.ds(0, cp), pl.ds(M + dy * W + dx, L)]
                if dx < 0:
                    tap = jnp.where(mask_left, tap, 0.0)
                elif dx > 0:
                    tap = jnp.where(mask_right, tap, 0.0)
                col_ref[pl.ds((ky * KSIZE + kx) * cp, cp), :] = tap

        # Single MXU contraction: (Co_p, 9*cp) x (9*cp, L) -> (Co_p, L).
        acc = jnp.dot(w_mat, col_ref[pl.ds(0, KSIZE * KSIZE * cp), :],
                      preferred_element_type=jnp.float32)

        # InstanceNorm2d (affine=False, biased variance, eps=1e-5) via fused
        # single-pass sum / sum-of-squares lane reductions (XLU) + EUP rsqrt.
        inv_n = 1.0 / L
        mean = jnp.sum(acc, axis=1, keepdims=True) * inv_n
        var = jnp.sum(acc * acc, axis=1, keepdims=True) * inv_n - mean * mean
        var = jnp.maximum(var, 0.0)                 # guard E[x^2]-m^2 cancellation
        y = (acc - mean) * lax.rsqrt(var + EPS)
        return jnp.maximum(y, 0.0)                  # ReLU

    h = stage(x_ref[0], w1_ref[...], Cin_p)         # stage 1
    o_ref[0] = stage(h, w2_ref[...], Cmid_p)        # stage 2


@jax.jit
def unet_block_forward(x_nchw, w1_oihw, w2_oihw):
    """UNet_block forward.  Inputs/outputs are NCHW / OIHW to match PyTorch."""
    N, Cin, H, W = x_nchw.shape
    Cmid = w1_oihw.shape[0]
    Cout = w2_oihw.shape[0]
    L = H * W
    M = _round_up(W + 1, 128)           # halo margin, kept 128-aligned (>= W+1)

    # Pad channel counts to the f32 sublane tile (8) so every in-kernel store /
    # matmul operand is tile-aligned.  Padded channels carry zeros end-to-end.
    Cin_p = _round_up(Cin, 8)
    Cmid_p = _round_up(Cmid, 8)
    Cout_p = _round_up(Cout, 8)
    Cmax_p = max(Cin_p, Cmid_p)

    # NCHW -> (N, C, H*W) is a free reshape (no transpose, no extra HBM pass).
    x = x_nchw.reshape(N, Cin, L)
    if Cin_p != Cin:
        x = jnp.pad(x, ((0, 0), (0, Cin_p - Cin), (0, 0)))

    def to_mat(w_oihw, co_p, ci_p):
        co, ci = w_oihw.shape[0], w_oihw.shape[1]
        w = jnp.pad(w_oihw, ((0, co_p - co), (0, ci_p - ci), (0, 0), (0, 0)))
        # (Co, Ci, kh, kw) -> (Co, kh, kw, Ci) -> (Co, 9*Ci): tap-major, channel-minor
        return jnp.transpose(w, (0, 2, 3, 1)).reshape(co_p, KSIZE * KSIZE * ci_p)

    w1m = to_mat(w1_oihw, Cmid_p, Cin_p)
    w2m = to_mat(w2_oihw, Cout_p, Cmid_p)

    kernel = functools.partial(_unet_block_kernel, H=H, W=W, M=M,
                               Cin_p=Cin_p, Cmid_p=Cmid_p)
    out = pl.pallas_call(
        kernel,
        out_shape=jax.ShapeDtypeStruct((N, Cout_p, L), jnp.float32),
        grid=(N,),
        in_specs=[
            pl.BlockSpec((1, Cin_p, L), lambda n: (n, 0, 0)),
            pl.BlockSpec((Cmid_p, KSIZE * KSIZE * Cin_p), lambda n: (0, 0)),
            pl.BlockSpec((Cout_p, KSIZE * KSIZE * Cmid_p), lambda n: (0, 0)),
        ],
        out_specs=pl.BlockSpec((1, Cout_p, L), lambda n: (n, 0, 0)),
        scratch_shapes=[
            pltpu.VMEM((Cmax_p, L + 2 * M), jnp.float32),            # shared halo buf
            pltpu.VMEM((KSIZE * KSIZE * Cmax_p, L), jnp.float32),    # shared im2col
        ],
        compiler_params=pltpu.CompilerParams(
            dimension_semantics=("parallel",),          # batch images across TCs
            vmem_limit_bytes=32 * 1024 * 1024),
    )(x, w1m, w2m)

    return out[:, :Cout, :].reshape(N, Cout, H, W)


# ----------------------------- pure JAX reference ----------------------------
def _ref_stage(x_nchw, w_oihw):
    y = lax.conv_general_dilated(
        x_nchw, w_oihw, window_strides=(1, 1), padding="SAME",
        dimension_numbers=("NCHW", "OIHW", "NCHW"))
    mean = jnp.mean(y, axis=(2, 3), keepdims=True)
    var = jnp.mean((y - mean) ** 2, axis=(2, 3), keepdims=True)
    y = (y - mean) * lax.rsqrt(var + EPS)
    return jnp.maximum(y, 0.0)


def unet_block_reference(x_nchw, w1_oihw, w2_oihw):
    return _ref_stage(_ref_stage(x_nchw, w1_oihw), w2_oihw)


# ---------------------------------- main -------------------------------------
if __name__ == "__main__":
    key = jax.random.PRNGKey(0)
    k_x, k_w1, k_w2 = jax.random.split(key, 3)

    N, Cin, H, W = 2, 4, 16, 16
    Cout = 8                       # middle_channel == out_channel

    x = jax.random.normal(k_x, (N, Cin, H, W), dtype=jnp.float32)
    # PyTorch-layout (OIHW) weights, deterministic kaiming-ish scale.
    w1 = jax.random.normal(k_w1, (Cout, Cin, KSIZE, KSIZE), jnp.float32) * (
        1.0 / (KSIZE * KSIZE * Cin) ** 0.5)
    w2 = jax.random.normal(k_w2, (Cout, Cout, KSIZE, KSIZE), jnp.float32) * (
        1.0 / (KSIZE * KSIZE * Cout) ** 0.5)

    out = jax.block_until_ready(unet_block_forward(x, w1, w2))
    ref = jax.block_until_ready(unet_block_reference(x, w1, w2))

    assert out.shape == (N, Cout, H, W), out.shape
    max_err = float(jnp.max(jnp.abs(out - ref)))
    assert jnp.allclose(out, ref, atol=5e-4, rtol=5e-4), max_err

    print("KERNEL_OK")
</pallas_src>

<mosaic_0001>
module attributes {stable_mosaic.version = 11 : i64} {
  func.func @_unet_block_kernel(%arg0: i32, %arg1: memref<1x8x256xf32, #tpu.memory_space<vmem>>, %arg2: memref<8x72xf32, #tpu.memory_space<vmem>>, %arg3: memref<8x72xf32, #tpu.memory_space<vmem>>, %arg4: memref<1x8x256xf32, #tpu.memory_space<vmem>>, %arg5: memref<8x512xf32, #tpu.memory_space<vmem>>, %arg6: memref<72x256xf32, #tpu.memory_space<vmem>>) attributes {dimension_semantics = [#tpu.dimension_semantics<parallel>], iteration_bounds = array<i64: 2>, scalar_prefetch = 0 : i64, scratch_operands = 2 : i64, tpu.core_type = #tpu.core_type<tc>, window_params = [{transform_indices = @transform_0, window_bounds = array<i64: 1, 8, 256>}, {pipeline_mode = #tpu.pipeline_mode<synchronous>, transform_indices = @transform_1, window_bounds = array<i64: 8, 72>}, {pipeline_mode = #tpu.pipeline_mode<synchronous>, transform_indices = @transform_2, window_bounds = array<i64: 8, 72>}, {transform_indices = @transform_3, window_bounds = array<i64: 1, 8, 256>}]} {
    %0 = tpu.iota {dimensions = array<i32: 1>} : vector<1x256xi32>
    %c16_i32 = arith.constant 16 : i32
    %c0_i32 = arith.constant 0 : i32
    %1 = arith.cmpi eq, %c16_i32, %c0_i32 : i32
    %c1_i32 = arith.constant 1 : i32
    %2 = arith.select %1, %c1_i32, %c16_i32 : i32
    %3 = vector.broadcast %2 : i32 to vector<1x256xi32>
    %4 = arith.remsi %0, %3 : vector<1x256xi32>
    %c0_i32_0 = arith.constant 0 : i32
    %5 = vector.broadcast %c0_i32_0 : i32 to vector<1x256xi32>
    %6 = arith.cmpi ne, %4, %5 : vector<1x256xi32>
    %c0_i32_1 = arith.constant 0 : i32
    %7 = vector.broadcast %c0_i32_1 : i32 to vector<1x256xi32>
    %8 = arith.cmpi slt, %4, %7 : vector<1x256xi32>
    %c0_i32_2 = arith.constant 0 : i32
    %9 = arith.cmpi slt, %2, %c0_i32_2 : i32
    %10 = vector.broadcast %9 : i1 to vector<1x256xi1>
    %11 = vector.broadcast %10 : vector<1x256xi1> to vector<1x256xi1>
    %12 = arith.xori %8, %11 : vector<1x256xi1>
    %13 = arith.andi %12, %6 : vector<1x256xi1>
    %14 = vector.broadcast %2 : i32 to vector<1x256xi32>
    %15 = arith.addi %4, %14 : vector<1x256xi32>
    %16 = arith.select %13, %15, %4 : vector<1x256xi1>, vector<1x256xi32>
    %c1_i32_3 = arith.constant 1 : i32
    %17 = vector.broadcast %c1_i32_3 : i32 to vector<1x256xi32>
    %18 = arith.cmpi sge, %16, %17 : vector<1x256xi32>
    %c15_i32 = arith.constant 15 : i32
    %19 = vector.broadcast %c15_i32 : i32 to vector<1x256xi32>
    %20 = arith.cmpi slt, %16, %19 : vector<1x256xi32>
    %cst = arith.constant 0.000000e+00 : f32
    %21 = vector.broadcast %cst : f32 to vector<8x128xf32>
    %c0 = arith.constant 0 : index
    %c0_4 = arith.constant 0 : index
    %22 = vector.load %arg5[%c0, %c0_4] : memref<8x512xf32, #tpu.memory_space<vmem>>, vector<8x128xf32>
    tpu.vector_store %arg5[%c0, %c0_4], %21 {strides = array<i32>} : memref<8x512xf32, #tpu.memory_space<vmem>>, vector<8x128xf32>,
    %c0_5 = arith.constant 0 : index
    %c384 = arith.constant 384 : index
    %23 = vector.load %arg5[%c0_5, %c384] : memref<8x512xf32, #tpu.memory_space<vmem>>, vector<8x128xf32>
    tpu.vector_store %arg5[%c0_5, %c384], %21 {strides = array<i32>} : memref<8x512xf32, #tpu.memory_space<vmem>>, vector<8x128xf32>,
    %c0_6 = arith.constant 0 : index
    %c0_7 = arith.constant 0 : index
    %c0_8 = arith.constant 0 : index
    %24 = vector.load %arg1[%c0_6, %c0_7, %c0_8] : memref<1x8x256xf32, #tpu.memory_space<vmem>>, vector<1x8x256xf32>
    %25 = vector.shape_cast %24 : vector<1x8x256xf32> to vector<8x256xf32>
    %c0_9 = arith.constant 0 : index
    %c0_10 = arith.constant 0 : index
    %26 = vector.load %arg2[%c0_9, %c0_10] : memref<8x72xf32, #tpu.memory_space<vmem>>, vector<8x72xf32>
    %c0_11 = arith.constant 0 : index
    %c128 = arith.constant 128 : index
    %27 = vector.load %arg5[%c0_11, %c128] : memref<8x512xf32, #tpu.memory_space<vmem>>, vector<8x256xf32>
    tpu.vector_store %arg5[%c0_11, %c128], %25 {strides = array<i32>} : memref<8x512xf32, #tpu.memory_space<vmem>>, vector<8x256xf32>,
    %c0_12 = arith.constant 0 : index
    %c111 = arith.constant 111 : index
    %28 = vector.load %arg5[%c0_12, %c111] : memref<8x512xf32, #tpu.memory_space<vmem>>, vector<8x256xf32>
    %cst_13 = arith.constant 0.000000e+00 : f32
    %29 = vector.shape_cast %18 : vector<1x256xi1> to vector<1x256xi1>
    %30 = vector.broadcast %29 : vector<1x256xi1> to vector<8x256xi1>
    %31 = vector.broadcast %cst_13 : f32 to vector<8x256xf32>
    %32 = arith.select %30, %28, %31 : vector<8x256xi1>, vector<8x256xf32>
    %c0_14 = arith.constant 0 : index
    %c0_15 = arith.constant 0 : index
    %33 = vector.load %arg6[%c0_14, %c0_15] : memref<72x256xf32, #tpu.memory_space<vmem>>, vector<8x256xf32>
    tpu.vector_store %arg6[%c0_14, %c0_15], %32 {strides = array<i32>} : memref<72x256xf32, #tpu.memory_space<vmem>>, vector<8x256xf32>,
    %c0_16 = arith.constant 0 : index
    %c112 = arith.constant 112 : index
    %34 = vector.load %arg5[%c0_16, %c112] : memref<8x512xf32, #tpu.memory_space<vmem>>, vector<8x256xf32>
    %c8 = arith.constant 8 : index
    %c0_17 = arith.constant 0 : index
    %35 = vector.load %arg6[%c8, %c0_17] : memref<72x256xf32, #tpu.memory_space<vmem>>, vector<8x256xf32>
    tpu.vector_store %arg6[%c8, %c0_17], %34 {strides = array<i32>} : memref<72x256xf32, #tpu.memory_space<vmem>>, vector<8x256xf32>,
    %c0_18 = arith.constant 0 : index
    %c113 = arith.constant 113 : index
    %36 = vector.load %arg5[%c0_18, %c113] : memref<8x512xf32, #tpu.memory_space<vmem>>, vector<8x256xf32>
    %cst_19 = arith.constant 0.000000e+00 : f32
    %37 = vector.shape_cast %20 : vector<1x256xi1> to vector<1x256xi1>
    %38 = vector.broadcast %37 : vector<1x256xi1> to vector<8x256xi1>
    %39 = vector.broadcast %cst_19 : f32 to vector<8x256xf32>
    %40 = arith.select %38, %36, %39 : vector<8x256xi1>, vector<8x256xf32>
    %c16 = arith.constant 16 : index
    %c0_20 = arith.constant 0 : index
    %41 = vector.load %arg6[%c16, %c0_20] : memref<72x256xf32, #tpu.memory_space<vmem>>, vector<8x256xf32>
    tpu.vector_store %arg6[%c16, %c0_20], %40 {strides = array<i32>} : memref<72x256xf32, #tpu.memory_space<vmem>>, vector<8x256xf32>,
    %c0_21 = arith.constant 0 : index
    %c127 = arith.constant 127 : index
    %42 = vector.load %arg5[%c0_21, %c127] : memref<8x512xf32, #tpu.memory_space<vmem>>, vector<8x256xf32>
    %cst_22 = arith.constant 0.000000e+00 : f32
    %43 = vector.shape_cast %18 : vector<1x256xi1> to vector<1x256xi1>
    %44 = vector.broadcast %43 : vector<1x256xi1> to vector<8x256xi1>
    %45 = vector.broadcast %cst_22 : f32 to vector<8x256xf32>
    %46 = arith.select %44, %42, %45 : vector<8x256xi1>, vector<8x256xf32>
    %c24 = arith.constant 24 : index
    %c0_23 = arith.constant 0 : index
    %47 = vector.load %arg6[%c24, %c0_23] : memref<72x256xf32, #tpu.memory_space<vmem>>, vector<8x256xf32>
    tpu.vector_store %arg6[%c24, %c0_23], %46 {strides = array<i32>} : memref<72x256xf32, #tpu.memory_space<vmem>>, vector<8x256xf32>,
    %c0_24 = arith.constant 0 : index
    %c128_25 = arith.constant 128 : index
    %48 = vector.load %arg5[%c0_24, %c128_25] : memref<8x512xf32, #tpu.memory_space<vmem>>, vector<8x256xf32>
    %c32 = arith.constant 32 : index
    %c0_26 = arith.constant 0 : index
    %49 = vector.load %arg6[%c32, %c0_26] : memref<72x256xf32, #tpu.memory_space<vmem>>, vector<8x256xf32>
    tpu.vector_store %arg6[%c32, %c0_26], %48 {strides = array<i32>} : memref<72x256xf32, #tpu.memory_space<vmem>>, vector<8x256xf32>,
    %c0_27 = arith.constant 0 : index
    %c129 = arith.constant 129 : index
    %50 = vector.load %arg5[%c0_27, %c129] : memref<8x512xf32, #tpu.memory_space<vmem>>, vector<8x256xf32>
    %cst_28 = arith.constant 0.000000e+00 : f32
    %51 = vector.shape_cast %20 : vector<1x256xi1> to vector<1x256xi1>
    %52 = vector.broadcast %51 : vector<1x256xi1> to vector<8x256xi1>
    %53 = vector.broadcast %cst_28 : f32 to vector<8x256xf32>
    %54 = arith.select %52, %50, %53 : vector<8x256xi1>, vector<8x256xf32>
    %c40 = arith.constant 40 : index
    %c0_29 = arith.constant 0 : index
    %55 = vector.load %arg6[%c40, %c0_29] : memref<72x256xf32, #tpu.memory_space<vmem>>, vector<8x256xf32>
    tpu.vector_store %arg6[%c40, %c0_29], %54 {strides = array<i32>} : memref<72x256xf32, #tpu.memory_space<vmem>>, vector<8x256xf32>,
    %c0_30 = arith.constant 0 : index
    %c143 = arith.constant 143 : index
    %56 = vector.load %arg5[%c0_30, %c143] : memref<8x512xf32, #tpu.memory_space<vmem>>, vector<8x256xf32>
    %cst_31 = arith.constant 0.000000e+00 : f32
    %57 = vector.shape_cast %18 : vector<1x256xi1> to vector<1x256xi1>
    %58 = vector.broadcast %57 : vector<1x256xi1> to vector<8x256xi1>
    %59 = vector.broadcast %cst_31 : f32 to vector<8x256xf32>
    %60 = arith.select %58, %56, %59 : vector<8x256xi1>, vector<8x256xf32>
    %c48 = arith.constant 48 : index
    %c0_32 = arith.constant 0 : index
    %61 = vector.load %arg6[%c48, %c0_32] : memref<72x256xf32, #tpu.memory_space<vmem>>, vector<8x256xf32>
    tpu.vector_store %arg6[%c48, %c0_32], %60 {strides = array<i32>} : memref<72x256xf32, #tpu.memory_space<vmem>>, vector<8x256xf32>,
    %c0_33 = arith.constant 0 : index
    %c144 = arith.constant 144 : index
    %62 = vector.load %arg5[%c0_33, %c144] : memref<8x512xf32, #tpu.memory_space<vmem>>, vector<8x256xf32>
    %c56 = arith.constant 56 : index
    %c0_34 = arith.constant 0 : index
    %63 = vector.load %arg6[%c56, %c0_34] : memref<72x256xf32, #tpu.memory_space<vmem>>, vector<8x256xf32>
    tpu.vector_store %arg6[%c56, %c0_34], %62 {strides = array<i32>} : memref<72x256xf32, #tpu.memory_space<vmem>>, vector<8x256xf32>,
    %c0_35 = arith.constant 0 : index
    %c145 = arith.constant 145 : index
    %64 = vector.load %arg5[%c0_35, %c145] : memref<8x512xf32, #tpu.memory_space<vmem>>, vector<8x256xf32>
    %cst_36 = arith.constant 0.000000e+00 : f32
    %65 = vector.shape_cast %20 : vector<1x256xi1> to vector<1x256xi1>
    %66 = vector.broadcast %65 : vector<1x256xi1> to vector<8x256xi1>
    %67 = vector.broadcast %cst_36 : f32 to vector<8x256xf32>
    %68 = arith.select %66, %64, %67 : vector<8x256xi1>, vector<8x256xf32>
    %c64 = arith.constant 64 : index
    %c0_37 = arith.constant 0 : index
    %69 = vector.load %arg6[%c64, %c0_37] : memref<72x256xf32, #tpu.memory_space<vmem>>, vector<8x256xf32>
    tpu.vector_store %arg6[%c64, %c0_37], %68 {strides = array<i32>} : memref<72x256xf32, #tpu.memory_space<vmem>>, vector<8x256xf32>,
    %c0_38 = arith.constant 0 : index
    %c0_39 = arith.constant 0 : index
    %70 = vector.load %arg6[%c0_38, %c0_39] : memref<72x256xf32, #tpu.memory_space<vmem>>, vector<72x256xf32>
    %cst_40 = arith.constant dense<0.000000e+00> : vector<8x256xf32>
    %71 = tpu.matmul %26, %70, %cst_40 {dimension_numbers = #tpu.dot_dimension_numbers<[1], [0], [0], [1], [0, 0, 1, 1], [], []>} : vector<8x72xf32>, vector<72x256xf32>, vector<8x256xf32> -> vector<8x256xf32>
    %cst_41 = arith.constant dense<0.000000e+00> : vector<8xf32>
    %72 = vector.multi_reduction <add>, %71, %cst_41 [1] : vector<8x256xf32> to vector<8xf32>
    %73 = vector.shape_cast %72 : vector<8xf32> to vector<8x1xf32>
    %cst_42 = arith.constant 3.906250e-03 : f32
    %74 = vector.broadcast %cst_42 : f32 to vector<8x1xf32>
    %75 = arith.mulf %73, %74 : vector<8x1xf32>
    %76 = arith.mulf %71, %71 : vector<8x256xf32>
    %cst_43 = arith.constant dense<0.000000e+00> : vector<8xf32>
    %77 = vector.multi_reduction <add>, %76, %cst_43 [1] : vector<8x256xf32> to vector<8xf32>
    %78 = vector.shape_cast %77 : vector<8xf32> to vector<8x1xf32>
    %cst_44 = arith.constant 3.906250e-03 : f32
    %79 = vector.broadcast %cst_44 : f32 to vector<8x1xf32>
    %80 = arith.mulf %78, %79 : vector<8x1xf32>
    %81 = arith.mulf %75, %75 : vector<8x1xf32>
    %82 = arith.subf %80, %81 : vector<8x1xf32>
    %cst_45 = arith.constant 0.000000e+00 : f32
    %83 = vector.broadcast %cst_45 : f32 to vector<8x1xf32>
    %84 = arith.maximumf %82, %83 : vector<8x1xf32>
    %85 = vector.broadcast %75 : vector<8x1xf32> to vector<8x256xf32>
    %86 = arith.subf %71, %85 : vector<8x256xf32>
    %cst_46 = arith.constant 9.99999974E-6 : f32
    %87 = vector.broadcast %cst_46 : f32 to vector<8x1xf32>
    %88 = arith.addf %84, %87 : vector<8x1xf32>
    %89 = math.rsqrt %88 : vector<8x1xf32>
    %90 = vector.broadcast %89 : vector<8x1xf32> to vector<8x256xf32>
    %91 = arith.mulf %86, %90 : vector<8x256xf32>
    %cst_47 = arith.constant 0.000000e+00 : f32
    %92 = vector.broadcast %cst_47 : f32 to vector<8x256xf32>
    %93 = arith.maximumf %91, %92 : vector<8x256xf32>
    %c0_48 = arith.constant 0 : index
    %c0_49 = arith.constant 0 : index
    %94 = vector.load %arg3[%c0_48, %c0_49] : memref<8x72xf32, #tpu.memory_space<vmem>>, vector<8x72xf32>
    %c0_50 = arith.constant 0 : index
    %c128_51 = arith.constant 128 : index
    %95 = vector.load %arg5[%c0_50, %c128_51] : memref<8x512xf32, #tpu.memory_space<vmem>>, vector<8x256xf32>
    tpu.vector_store %arg5[%c0_50, %c128_51], %93 {strides = array<i32>} : memref<8x512xf32, #tpu.memory_space<vmem>>, vector<8x256xf32>,
    %c0_52 = arith.constant 0 : index
    %c111_53 = arith.constant 111 : index
    %96 = vector.load %arg5[%c0_52, %c111_53] : memref<8x512xf32, #tpu.memory_space<vmem>>, vector<8x256xf32>
    %cst_54 = arith.constant 0.000000e+00 : f32
    %97 = vector.shape_cast %18 : vector<1x256xi1> to vector<1x256xi1>
    %98 = vector.broadcast %97 : vector<1x256xi1> to vector<8x256xi1>
    %99 = vector.broadcast %cst_54 : f32 to vector<8x256xf32>
    %100 = arith.select %98, %96, %99 : vector<8x256xi1>, vector<8x256xf32>
    %c0_55 = arith.constant 0 : index
    %c0_56 = arith.constant 0 : index
    %101 = vector.load %arg6[%c0_55, %c0_56] : memref<72x256xf32, #tpu.memory_space<vmem>>, vector<8x256xf32>
    tpu.vector_store %arg6[%c0_55, %c0_56], %100 {strides = array<i32>} : memref<72x256xf32, #tpu.memory_space<vmem>>, vector<8x256xf32>,
    %c0_57 = arith.constant 0 : index
    %c112_58 = arith.constant 112 : index
    %102 = vector.load %arg5[%c0_57, %c112_58] : memref<8x512xf32, #tpu.memory_space<vmem>>, vector<8x256xf32>
    %c8_59 = arith.constant 8 : index
    %c0_60 = arith.constant 0 : index
    %103 = vector.load %arg6[%c8_59, %c0_60] : memref<72x256xf32, #tpu.memory_space<vmem>>, vector<8x256xf32>
    tpu.vector_store %arg6[%c8_59, %c0_60], %102 {strides = array<i32>} : memref<72x256xf32, #tpu.memory_space<vmem>>, vector<8x256xf32>,
    %c0_61 = arith.constant 0 : index
    %c113_62 = arith.constant 113 : index
    %104 = vector.load %arg5[%c0_61, %c113_62] : memref<8x512xf32, #tpu.memory_space<vmem>>, vector<8x256xf32>
    %cst_63 = arith.constant 0.000000e+00 : f32
    %105 = vector.shape_cast %20 : vector<1x256xi1> to vector<1x256xi1>
    %106 = vector.broadcast %105 : vector<1x256xi1> to vector<8x256xi1>
    %107 = vector.broadcast %cst_63 : f32 to vector<8x256xf32>
    %108 = arith.select %106, %104, %107 : vector<8x256xi1>, vector<8x256xf32>
    %c16_64 = arith.constant 16 : index
    %c0_65 = arith.constant 0 : index
    %109 = vector.load %arg6[%c16_64, %c0_65] : memref<72x256xf32, #tpu.memory_space<vmem>>, vector<8x256xf32>
    tpu.vector_store %arg6[%c16_64, %c0_65], %108 {strides = array<i32>} : memref<72x256xf32, #tpu.memory_space<vmem>>, vector<8x256xf32>,
    %c0_66 = arith.constant 0 : index
    %c127_67 = arith.constant 127 : index
    %110 = vector.load %arg5[%c0_66, %c127_67] : memref<8x512xf32, #tpu.memory_space<vmem>>, vector<8x256xf32>
    %cst_68 = arith.constant 0.000000e+00 : f32
    %111 = vector.shape_cast %18 : vector<1x256xi1> to vector<1x256xi1>
    %112 = vector.broadcast %111 : vector<1x256xi1> to vector<8x256xi1>
    %113 = vector.broadcast %cst_68 : f32 to vector<8x256xf32>
    %114 = arith.select %112, %110, %113 : vector<8x256xi1>, vector<8x256xf32>
    %c24_69 = arith.constant 24 : index
    %c0_70 = arith.constant 0 : index
    %115 = vector.load %arg6[%c24_69, %c0_70] : memref<72x256xf32, #tpu.memory_space<vmem>>, vector<8x256xf32>
    tpu.vector_store %arg6[%c24_69, %c0_70], %114 {strides = array<i32>} : memref<72x256xf32, #tpu.memory_space<vmem>>, vector<8x256xf32>,
    %c0_71 = arith.constant 0 : index
    %c128_72 = arith.constant 128 : index
    %116 = vector.load %arg5[%c0_71, %c128_72] : memref<8x512xf32, #tpu.memory_space<vmem>>, vector<8x256xf32>
    %c32_73 = arith.constant 32 : index
    %c0_74 = arith.constant 0 : index
    %117 = vector.load %arg6[%c32_73, %c0_74] : memref<72x256xf32, #tpu.memory_space<vmem>>, vector<8x256xf32>
    tpu.vector_store %arg6[%c32_73, %c0_74], %116 {strides = array<i32>} : memref<72x256xf32, #tpu.memory_space<vmem>>, vector<8x256xf32>,
    %c0_75 = arith.constant 0 : index
    %c129_76 = arith.constant 129 : index
    %118 = vector.load %arg5[%c0_75, %c129_76] : memref<8x512xf32, #tpu.memory_space<vmem>>, vector<8x256xf32>
    %cst_77 = arith.constant 0.000000e+00 : f32
    %119 = vector.shape_cast %20 : vector<1x256xi1> to vector<1x256xi1>
    %120 = vector.broadcast %119 : vector<1x256xi1> to vector<8x256xi1>
    %121 = vector.broadcast %cst_77 : f32 to vector<8x256xf32>
    %122 = arith.select %120, %118, %121 : vector<8x256xi1>, vector<8x256xf32>
    %c40_78 = arith.constant 40 : index
    %c0_79 = arith.constant 0 : index
    %123 = vector.load %arg6[%c40_78, %c0_79] : memref<72x256xf32, #tpu.memory_space<vmem>>, vector<8x256xf32>
    tpu.vector_store %arg6[%c40_78, %c0_79], %122 {strides = array<i32>} : memref<72x256xf32, #tpu.memory_space<vmem>>, vector<8x256xf32>,
    %c0_80 = arith.constant 0 : index
    %c143_81 = arith.constant 143 : index
    %124 = vector.load %arg5[%c0_80, %c143_81] : memref<8x512xf32, #tpu.memory_space<vmem>>, vector<8x256xf32>
    %cst_82 = arith.constant 0.000000e+00 : f32
    %125 = vector.shape_cast %18 : vector<1x256xi1> to vector<1x256xi1>
    %126 = vector.broadcast %125 : vector<1x256xi1> to vector<8x256xi1>
    %127 = vector.broadcast %cst_82 : f32 to vector<8x256xf32>
    %128 = arith.select %126, %124, %127 : vector<8x256xi1>, vector<8x256xf32>
    %c48_83 = arith.constant 48 : index
    %c0_84 = arith.constant 0 : index
    %129 = vector.load %arg6[%c48_83, %c0_84] : memref<72x256xf32, #tpu.memory_space<vmem>>, vector<8x256xf32>
    tpu.vector_store %arg6[%c48_83, %c0_84], %128 {strides = array<i32>} : memref<72x256xf32, #tpu.memory_space<vmem>>, vector<8x256xf32>,
    %c0_85 = arith.constant 0 : index
    %c144_86 = arith.constant 144 : index
    %130 = vector.load %arg5[%c0_85, %c144_86] : memref<8x512xf32, #tpu.memory_space<vmem>>, vector<8x256xf32>
    %c56_87 = arith.constant 56 : index
    %c0_88 = arith.constant 0 : index
    %131 = vector.load %arg6[%c56_87, %c0_88] : memref<72x256xf32, #tpu.memory_space<vmem>>, vector<8x256xf32>
    tpu.vector_store %arg6[%c56_87, %c0_88], %130 {strides = array<i32>} : memref<72x256xf32, #tpu.memory_space<vmem>>, vector<8x256xf32>,
    %c0_89 = arith.constant 0 : index
    %c145_90 = arith.constant 145 : index
    %132 = vector.load %arg5[%c0_89, %c145_90] : memref<8x512xf32, #tpu.memory_space<vmem>>, vector<8x256xf32>
    %cst_91 = arith.constant 0.000000e+00 : f32
    %133 = vector.shape_cast %20 : vector<1x256xi1> to vector<1x256xi1>
    %134 = vector.broadcast %133 : vector<1x256xi1> to vector<8x256xi1>
    %135 = vector.broadcast %cst_91 : f32 to vector<8x256xf32>
    %136 = arith.select %134, %132, %135 : vector<8x256xi1>, vector<8x256xf32>
    %c64_92 = arith.constant 64 : index
    %c0_93 = arith.constant 0 : index
    %137 = vector.load %arg6[%c64_92, %c0_93] : memref<72x256xf32, #tpu.memory_space<vmem>>, vector<8x256xf32>
    tpu.vector_store %arg6[%c64_92, %c0_93], %136 {strides = array<i32>} : memref<72x256xf32, #tpu.memory_space<vmem>>, vector<8x256xf32>,
    %c0_94 = arith.constant 0 : index
    %c0_95 = arith.constant 0 : index
    %138 = vector.load %arg6[%c0_94, %c0_95] : memref<72x256xf32, #tpu.memory_space<vmem>>, vector<72x256xf32>
    %cst_96 = arith.constant dense<0.000000e+00> : vector<8x256xf32>
    %139 = tpu.matmul %94, %138, %cst_96 {dimension_numbers = #tpu.dot_dimension_numbers<[1], [0], [0], [1], [0, 0, 1, 1], [], []>} : vector<8x72xf32>, vector<72x256xf32>, vector<8x256xf32> -> vector<8x256xf32>
    %cst_97 = arith.constant dense<0.000000e+00> : vector<8xf32>
    %140 = vector.multi_reduction <add>, %139, %cst_97 [1] : vector<8x256xf32> to vector<8xf32>
    %141 = vector.shape_cast %140 : vector<8xf32> to vector<8x1xf32>
    %cst_98 = arith.constant 3.906250e-03 : f32
    %142 = vector.broadcast %cst_98 : f32 to vector<8x1xf32>
    %143 = arith.mulf %141, %142 : vector<8x1xf32>
    %144 = arith.mulf %139, %139 : vector<8x256xf32>
    %cst_99 = arith.constant dense<0.000000e+00> : vector<8xf32>
    %145 = vector.multi_reduction <add>, %144, %cst_99 [1] : vector<8x256xf32> to vector<8xf32>
    %146 = vector.shape_cast %145 : vector<8xf32> to vector<8x1xf32>
    %cst_100 = arith.constant 3.906250e-03 : f32
    %147 = vector.broadcast %cst_100 : f32 to vector<8x1xf32>
    %148 = arith.mulf %146, %147 : vector<8x1xf32>
    %149 = arith.mulf %143, %143 : vector<8x1xf32>
    %150 = arith.subf %148, %149 : vector<8x1xf32>
    %cst_101 = arith.constant 0.000000e+00 : f32
    %151 = vector.broadcast %cst_101 : f32 to vector<8x1xf32>
    %152 = arith.maximumf %150, %151 : vector<8x1xf32>
    %153 = vector.broadcast %143 : vector<8x1xf32> to vector<8x256xf32>
    %154 = arith.subf %139, %153 : vector<8x256xf32>
    %cst_102 = arith.constant 9.99999974E-6 : f32
    %155 = vector.broadcast %cst_102 : f32 to vector<8x1xf32>
    %156 = arith.addf %152, %155 : vector<8x1xf32>
    %157 = math.rsqrt %156 : vector<8x1xf32>
    %158 = vector.broadcast %157 : vector<8x1xf32> to vector<8x256xf32>
    %159 = arith.mulf %154, %158 : vector<8x256xf32>
    %cst_103 = arith.constant 0.000000e+00 : f32
    %160 = vector.broadcast %cst_103 : f32 to vector<8x256xf32>
    %161 = arith.maximumf %159, %160 : vector<8x256xf32>
    %c0_104 = arith.constant 0 : index
    %c0_105 = arith.constant 0 : index
    %c0_106 = arith.constant 0 : index
    %162 = vector.load %arg4[%c0_104, %c0_105, %c0_106] : memref<1x8x256xf32, #tpu.memory_space<vmem>>, vector<1x8x256xf32>
    %163 = vector.shape_cast %162 : vector<1x8x256xf32> to vector<8x256xf32>
    %164 = vector.shape_cast %161 : vector<8x256xf32> to vector<1x8x256xf32>
    tpu.vector_store %arg4[%c0_104, %c0_105, %c0_106], %164 {strides = array<i32>} : memref<1x8x256xf32, #tpu.memory_space<vmem>>, vector<1x8x256xf32>,
    return
  }
  func.func @transform_0(%arg0: i32) -> (i32, i32, i32) {
    %c0_i32 = arith.constant 0 : i32
    %c0_i32_0 = arith.constant 0 : i32
    %c0_i32_1 = arith.constant 0 : i32
    return %arg0, %c0_i32, %c0_i32_0 : i32, i32, i32
  }
  func.func @transform_1(%arg0: i32) -> (i32, i32) {
    %c0_i32 = arith.constant 0 : i32
    %c0_i32_0 = arith.constant 0 : i32
    %c0_i32_1 = arith.constant 0 : i32
    return %c0_i32, %c0_i32_0 : i32, i32
  }
  func.func @transform_2(%arg0: i32) -> (i32, i32) {
    %c0_i32 = arith.constant 0 : i32
    %c0_i32_0 = arith.constant 0 : i32
    %c0_i32_1 = arith.constant 0 : i32
    return %c0_i32, %c0_i32_0 : i32, i32
  }
  func.func @transform_3(%arg0: i32) -> (i32, i32, i32) {
    %c0_i32 = arith.constant 0 : i32
    %c0_i32_0 = arith.constant 0 : i32
    %c0_i32_1 = arith.constant 0 : i32
    return %arg0, %c0_i32, %c0_i32_0 : i32, i32, i32
  }
}

</mosaic_0001>

<bundles_post_ra>
// kernel: unet_block_forward.1
= control target key start
LH: loop header
LB: loop body
LE: loop exit
PB: predicated region body
PF: predicated region fallthrough
CT: control target
= control target key end

     0   :  { %s1049_s12 = smov 0   ;;  %s1293_s0 = inlined_call_operand.vmem [shape: f32[2,8,256], index: 0, kind: input, shape index: {}]   ;;  %s1294_s1 = inlined_call_operand.vmem [shape: f32[8,72], index: 1, kind: input, shape index: {}]   ;;  %s1295_s2 = inlined_call_operand.vmem [shape: f32[8,72], index: 2, kind: input, shape index: {}]   ;;  %s1296_s3 = inlined_call_operand.vmem [shape: f32[2,8,256], index: 3, kind: output, shape index: {}]  }
   0x1 LB: > { %s832_s13 = sadd.s32 4294967295, %s1017_s12   ;;  %p836_p0 = scmp.ge.s32.totalorder %s1017_s12, 1  ;;  %s1017_s12 = sphi %s1049_s12, %s13_s12  }
   0x2   : > { %p137_p1 = scmp.lt.s32.totalorder %s1017_s12, 3 }
   0x4   : > { %p138_p2 = pnand %p836_p0, %p137_p1 }
   0x5   : > { %p161_p3 = scmp.lt.s32.totalorder (!%p138_p2), %s832_s13, 1  ;;  %v1019_v0 = vmov (!%p138_p2), 0.0   ;;  %s1020_s14 = smov (!%p138_p2), 17   ;;  %v171_v5 = vlaneseq (!%p138_p2)  ;;  %vm225_vm0 = vcmask (!%p138_p2), 138240   ;;  %vm246_vm2 = vcmask (!%p138_p2), 130048  }
   0x6   : > { %141 = sbr.rel (%p138_p2) target bundleno = 1076 (0x434), region = 32  ;;  %219 = vrot.lane.b32.xlu1 (!%p138_p2), %v1019_v0, %s1020_s14  ;;  %471 = vmatprep.mubr.f32.mxu0 (!%p138_p2), %v1019_v0  ;;  %s1021_s19 = smov (!%p138_p2), 16   ;;  %vm290_vm4 = vcmask (!%p138_p2), 7168   ;;  %vm1028_vm5 = vmmov (!%p138_p2), 1   ;;  %vm269_vm8 = vcmask (!%p138_p2), 121856   ;;  %vm1298_vm13 = vcmask (!%p138_p2), 1039360  }
   0x7   : > { %747 = vmatprep.mubr.f32.mxu1 (!%p138_p2), %v1019_v0  ;;  %s1022_s20 = smov (!%p138_p2), 1   ;;  %s1023_s21 = smov (!%p138_p2), 15   ;;  %v172_v7 = vand.u32 (!%p138_p2), 127, %v171_v5  ;;  %vm357_vm14 = vcmask (!%p138_p2), 916480  }
   0x8   : > { %s1024_s22 = smov (!%p138_p2), 127   ;;  %s1025_s23 = smov (!%p138_p2), 112  }
   0x9   : > { %s1026_s24 = smov (!%p138_p2), 113   ;;  %s1027_s25 = smov (!%p138_p2), 111   ;;  %v173_v9 = vadd.s32 (!%p138_p2), 128, %v172_v7  ;;  %v178_v13 = vand.u32 (!%p138_p2), 15, %v172_v7 }
   0xa   : > { %240 = vrot.lane.b32.xlu1 (!%p138_p2), %v1019_v0, %s1021_s19 }
   0xb   : > { %v185_v12 = vand.u32 (!%p138_p2), 15, %v173_v9  ;;  %vm1106_vm3 = vcmp.ge.s32.totalorder (!%p138_p2), %v178_v13, 1  ;;  %vm1135_vm10 = vcmp.lt.s32.totalorder (!%p138_p2), %v178_v13, 15  ;;  %v206_v9 = vld [vmem:[%s1294_s1] sm:$0xff] (!%p138_p2) }
   0xc   : > { %vm1124_vm7 = vmpackc.low (!%p138_p2), %vm1028_vm5, %vm1106_vm3 }
   0xd   : > { %s1322_s13 = smov (!%p161_p3, %s832_s13), 1  ;;  %vm1102_vm1 = vcmp.ge.s32.totalorder %v185_v12, 1  ;;  %vm1128_vm9 = vcmp.lt.s32.totalorder %v185_v12, 15  ;;  %vm1297_vm12 = vmpackc.low %vm1106_vm3, %vm1135_vm10 }
   0xe   : > { %s845_s15 = sshll.u32 %s1322_s13, 4  ;;  %vm1115_vm6 = vmpackc.low %vm1028_vm5, %vm1102_vm1 }
   0xf   : > { %s165_s18 = scalar_lea.vmem %s1293_s0, %s845_s15  ;;  %vm878_vm11 = vmpackc.low %vm1102_vm1, %vm1128_vm9  ;;  %vm1319_vm1 = vcmask 924672   ;;  %s170_s5 = scalar_lea.vmem %s1296_s3, %s845_s15 }
  0x10   : > { %v1071_v1 = vld [vmem:[%s165_s18] sm:$0xff]  ;;  %v1073_v2 = vld [vmem:[%s165_s18 + $0x8] sm:$0xff]  ;;  %vm1167_vm15 = vmpackc.low %vm1128_vm9, %vm1028_vm5 }
  0x11   : > { %v937_v3 = vpack.i.bf16 %v1073_v2, %v1071_v1  ;;  %v967_v4 = vpack.i.bf16 %v1019_v0, %v1073_v2 }
  0x13   : > { %938 = vrot.lane.b32.xlu0 %v937_v3, %s1020_s14  ;;  %953 = vrot.lane.b32.xlu1 %v937_v3, %s1022_s20 }
  0x17   : > { %943 = vrot.lane.b32.xlu0 %v937_v3, %s1021_s19  ;;  %284 = vrot.lane.b32.xlu1 %v1019_v0, %s1022_s20 }
  0x1b   : > { %948 = vrot.lane.b32.xlu0 %v937_v3, %s1023_s21  ;;  %309 = vrot.lane.b32.xlu1 %v1071_v1, %s1024_s22 }
  0x1f   : > { %263 = vrot.lane.b32.xlu0 %v1019_v0, %s1023_s21  ;;  %968 = vrot.lane.b32.xlu1 %v967_v4, %s1025_s23 }
  0x23   : > { %958 = vrot.lane.b32.xlu0 %v967_v4, %s1024_s22  ;;  %351 = vrot.lane.b32.xlu1 %v1071_v1, %s1025_s23 }
  0x27   : > { %963 = vrot.lane.b32.xlu0 %v967_v4, %s1026_s24  ;;  %374 = vrot.lane.b32.xlu1 %v1019_v0, %s1027_s25 }
  0x2b   : > { %330 = vrot.lane.b32.xlu0 %v1071_v1, %s1026_s24 }
  0x2f   : > { %372 = vrot.lane.b32.xlu0 %v1073_v2, %s1027_s25 }
  0x33   : > { %370 = vrot.lane.b32.xlu0 %v1071_v1, %s1027_s25 }
  0x78   : > { %v220_v6 = vpop.permute.xlu1 %219 }
  0x7c   : > { %v241_v8 = vpop.permute.xlu1 %240 }
  0x85   : > { %v939_v10 = vpop.permute.xlu0 %938  ;;  %v954_v11 = vpop.permute.xlu1 %953 }
  0x86   : > { %v941_v14 = vunpack.i.h.bf16 %v939_v10  ;;  %v940_v15 = vunpack.i.l.bf16 %v939_v10  ;;  %v956_v22 = vunpack.i.h.bf16 %v954_v11  ;;  %v955_v23 = vunpack.i.l.bf16 %v954_v11 }
  0x88   : > { %v227_v24 = vsel %vm225_vm0, %v940_v15, %v941_v14  ;;  %v226_v27 = vsel %vm225_vm0, %v220_v6, %v940_v15  ;;  %v292_v37 = vsel %vm290_vm4, %v955_v23, %v956_v22 }
  0x89   : > { %v944_v16 = vpop.permute.xlu0 %943  ;;  %v285_v19 = vpop.permute.xlu1 %284 }
  0x8a   : > { %v946_v20 = vunpack.i.h.bf16 %v944_v16  ;;  %v945_v21 = vunpack.i.l.bf16 %v944_v16  ;;  %v291_v39 = vsel %vm290_vm4, %v285_v19, %v955_v23 }
  0x8c   : > { %v248_v25 = vsel %vm246_vm2, %v945_v21, %v946_v20  ;;  %v247_v28 = vsel %vm246_vm2, %v241_v8, %v945_v21 }
  0x8d   : > { %v949_v29 = vpop.permute.xlu0 %948  ;;  %v871_v30 = vpack.c.bf16 %v248_v25, %v227_v24  ;;  %v874_v31 = vpack.c.bf16 %v247_v28, %v226_v27  ;;  %v310_v34 = vpop.permute.xlu1 %309 }
  0x8e   : > { %v951_v35 = vunpack.i.h.bf16 %v949_v29  ;;  %v950_v36 = vunpack.i.l.bf16 %v949_v29 }
  0x8f   : > { %873 = vmatprep.subr.msk.bf16.mxu0 %vm1115_vm6, %v871_v30 }
  0x90   : > { %876 = vmatpush1.bf16.msk.msra.mxu0 %vm1124_vm7, %v874_v31  ;;  %v271_v40 = vsel %vm269_vm8, %v950_v36, %v951_v35 }
  0x91   : > { %v264_v41 = vpop.permute.xlu0 %263  ;;  %v877_v42 = vpack.c.bf16 %v292_v37, %v271_v40  ;;  %v969_v45 = vpop.permute.xlu1 %968 }
  0x92   : > { %v270_v43 = vsel %vm269_vm8, %v264_v41, %v950_v36  ;;  %v971_v49 = vunpack.i.h.bf16 %v969_v45  ;;  %v970_v50 = vunpack.i.l.bf16 %v969_v45 }
  0x93   : > { %v880_v44 = vpack.c.bf16 %v291_v39, %v270_v43  ;;  %879 = vmatprep.subr.msk.bf16.mxu0 %vm878_vm11, %v877_v42 }
  0x94   : > { %v359_v61 = vsel %vm357_vm14, %v970_v50, %v971_v49 }
  0x95   : > { %v959_v46 = vpop.permute.xlu0 %958  ;;  %882 = vmatpush1.bf16.msk.msra.mxu0 %vm1297_vm12, %v880_v44  ;;  %vm1176_vm12 = vmpackc.low %vm1135_vm10, %vm1028_vm5  ;;  %v352_v58 = vpop.permute.xlu1 %351  ;;  %vm376_vm5 = vcmask 908288  }
  0x96   : > { %v961_v47 = vunpack.i.h.bf16 %v959_v46  ;;  %v960_v48 = vunpack.i.l.bf16 %v959_v46  ;;  %v358_v62 = vsel %vm357_vm14, %v352_v58, %v970_v50 }
  0x98   : > { %v316_v51 = vsel %vm1298_vm13, %v310_v34, %v960_v48  ;;  %v317_v52 = vsel %vm1298_vm13, %v960_v48, %v961_v47  ;;  %vm1299_vm13 = vcmask 924672  }
  0x99   : > { %v883_v54 = vpack.c.bf16 %v317_v52, %v1073_v2  ;;  %v886_v55 = vpack.c.bf16 %v316_v51, %v1071_v1  ;;  %v964_v56 = vpop.permute.xlu0 %963  ;;  %v375_v5 = vpop.permute.xlu1 %374 }
  0x9a   : > { %v966_v59 = vunpack.i.h.bf16 %v964_v56  ;;  %v965_v60 = vunpack.i.l.bf16 %v964_v56 }
  0x9b   : > { %885 = vmatprep.subr.msk.bf16.mxu0 %vm1167_vm15, %v883_v54 }
  0x9c   : > { %888 = vmatpush1.bf16.msk.msra.mxu0 %vm1176_vm12, %v886_v55  ;;  %v338_v63 = vsel %vm1299_vm13, %v965_v60, %v966_v59 }
  0x9d   : > { %v331_v1 = vpop.permute.xlu0 %330  ;;  %v889_v2 = vpack.c.bf16 %v359_v61, %v338_v63 }
  0x9e   : > { %v337_v3 = vsel %vm1299_vm13, %v331_v1, %v965_v60  ;;  %vm403_vm13 = vcmask 588800  }
  0x9f   : > { %v892_v4 = vpack.c.bf16 %v358_v62, %v337_v3  ;;  %891 = vmatprep.subr.msk.bf16.mxu0 %vm1115_vm6, %v889_v2 }
  0xa1   : > { %v373_v6 = vpop.permute.xlu0 %372  ;;  %894 = vmatpush1.bf16.msk.msra.mxu0 %vm1124_vm7, %v892_v4 }
  0xa2   : > { %v378_v7 = vsel %vm376_vm5, %v373_v6, %v375_v5 }
  0xa3   : > { %857 = vmatprep.subr.msk.mxu0 %vm1128_vm9, %v378_v7 }
  0xa5   : > { %v371_v8 = vpop.permute.xlu0 %370 }
  0xa6   : > { %v377_v10 = vsel %vm376_vm5, %v371_v8, %v373_v6 }
  0xa7   : > { %858 = vmatpush1.msk.msra.mxu0 %vm1135_vm10, %v377_v10 }
  0xa8   : > { %841 = vmatmul.mubr.msk.f32.vlgmr.msra.gmra.mrb[0].mxu0 %vm403_vm13, %v206_v9 }
 0x17b   : > { %v473_v11 = vpop.f32.mrb[0].mxu0 }
 0x17c   : > { %v475_v12 = vpop.f32.mrb[1].mxu0  ;;  %v482_v13 = vmul.f32 %v473_v11, %v473_v11 }
 0x17d   : > { %v483_v14 = vmul.f32 %v475_v12, %v475_v12  ;;  %v478_v15 = vadd.f32 %v475_v12, %v473_v11 }
 0x17f   : > { %479 = vadd.xlane.f32.xlu1 %v478_v15  ;;  %v484_v16 = vadd.f32 %v483_v14, %v482_v13 }
 0x181   : > { %485 = vadd.xlane.f32.xlu0 %v484_v16 }
 0x190   : > { %508 = vrot.lane.b32.xlu1 %v1019_v0, %s1020_s14 }
 0x194   : > { %546 = vrot.lane.b32.xlu1 %v1019_v0, %s1023_s21 }
 0x197   : > { %528 = vrot.lane.b32.xlu0 %v1019_v0, %s1021_s19 }
 0x19b   : > { %566 = vrot.lane.b32.xlu0 %v1019_v0, %s1022_s20 }
 0x20c   : > { %v480_v19 = vpop.xlane.xlu1 %479 }
 0x20d   : > { %v481_v20 = vmul.f32 0.00390625, %v480_v19 }
 0x20e   : > { %v486_v21 = vpop.xlane.xlu0 %485 }
 0x20f   : > { %v487_v22 = vmul.f32 0.00390625, %v486_v21  ;;  %v488_v23 = vmul.f32 %v481_v20, %v481_v20  ;;  %v491_v28 = vsub.f32 %v473_v11, %v481_v20  ;;  %v492_v29 = vsub.f32 %v475_v12, %v481_v20 }
 0x210   : > { %v509_v41 = vpop.permute.xlu1 %508 }
 0x211   : > { %v489_v24 = vsub.f32 %v487_v22, %v488_v23 }
 0x212   : > { %v529_v40 = vpop.permute.xlu0 %528 }
 0x213   : > { %v490_v25 = vmax.f32 %v489_v24, 0.0 }
 0x214   : > { %v547_v43 = vpop.permute.xlu1 %546 }
 0x215   : > { %v493_v27 = vadd.f32 1e-05, %v490_v25 }
 0x216   : > { %v567_v42 = vpop.permute.xlu0 %566 }
 0x217   : > { %1007 = vrsqrt.f32 %v493_v27 }
 0x221   : > { %v1008_v30 = vpop.eup %1007 }
 0x222   : > { %v495_v31 = vmul.f32 %v1008_v30, %v491_v28  ;;  %v496_v34 = vmul.f32 %v1008_v30, %v492_v29 }
 0x224   : > { %v1210_v35 = vmax.f32 %v495_v31, 0.0  ;;  %v1212_v36 = vmax.f32 %v496_v34, 0.0  ;;  %v499_v31 = vld [vmem:[%s1295_s2] sm:$0xff] }
 0x226   : > { %v977_v37 = vpack.i.bf16 %v1212_v36, %v1210_v35  ;;  %v992_v39 = vpack.i.bf16 %v1019_v0, %v1212_v36 }
 0x228   : > { %978 = vrot.lane.b32.xlu1 %v977_v37, %s1021_s19  ;;  %973 = vrot.lane.b32.xlu0 %v977_v37, %s1020_s14 }
 0x22c   : > { %983 = vrot.lane.b32.xlu1 %v977_v37, %s1023_s21  ;;  %988 = vrot.lane.b32.xlu0 %v977_v37, %s1022_s20 }
 0x230   : > { %993 = vrot.lane.b32.xlu1 %v992_v39, %s1024_s22  ;;  %590 = vrot.lane.b32.xlu0 %v1210_v35, %s1024_s22 }
 0x234   : > { %998 = vrot.lane.b32.xlu1 %v992_v39, %s1026_s24  ;;  %1003 = vrot.lane.b32.xlu0 %v992_v39, %s1025_s23 }
 0x238   : > { %610 = vrot.lane.b32.xlu1 %v1210_v35, %s1026_s24  ;;  %630 = vrot.lane.b32.xlu0 %v1210_v35, %s1025_s23 }
 0x23c   : > { %650 = vrot.lane.b32.xlu1 %v1212_v36, %s1027_s25  ;;  %652 = vrot.lane.b32.xlu0 %v1019_v0, %s1027_s25 }
 0x240   : > { %648 = vrot.lane.b32.xlu1 %v1210_v35, %s1027_s25 }
 0x29a   : > { %v974_v44 = vpop.permute.xlu0 %973  ;;  %v979_v45 = vpop.permute.xlu1 %978 }
 0x29b   : > { %v976_v46 = vunpack.i.h.bf16 %v974_v44  ;;  %v975_v47 = vunpack.i.l.bf16 %v974_v44  ;;  %v981_v48 = vunpack.i.h.bf16 %v979_v45  ;;  %v980_v49 = vunpack.i.l.bf16 %v979_v45 }
 0x29d   : > { %v515_v50 = vsel %vm225_vm0, %v975_v47, %v976_v46  ;;  %v535_v51 = vsel %vm246_vm2, %v980_v49, %v981_v48  ;;  %v514_v52 = vsel %vm225_vm0, %v509_v41, %v975_v47  ;;  %v534_v0 = vsel %vm246_vm2, %v529_v40, %v980_v49 }
 0x29e   : > { %v989_v54 = vpop.permute.xlu0 %988  ;;  %v984_v55 = vpop.permute.xlu1 %983  ;;  %v895_v56 = vpack.c.bf16 %v535_v51, %v515_v50  ;;  %v898_v58 = vpack.c.bf16 %v534_v0, %v514_v52  ;;  %vm1316_vm0 = vcmask 1039360  }
 0x29f   : > { %v991_v59 = vunpack.i.h.bf16 %v989_v54  ;;  %v990_v60 = vunpack.i.l.bf16 %v989_v54  ;;  %v986_v61 = vunpack.i.h.bf16 %v984_v55  ;;  %v985_v62 = vunpack.i.l.bf16 %v984_v55  ;;  %vm1317_vm2 = vmmov %vm1316_vm0 }
 0x2a0   : > { %897 = vmatprep.subr.msk.bf16.mxu1 %vm1115_vm6, %v895_v56 }
 0x2a1   : > { %v572_v63 = vsel %vm290_vm4, %v567_v42, %v990_v60  ;;  %v573_v1 = vsel %vm290_vm4, %v990_v60, %v991_v59  ;;  %v552_v2 = vsel %vm269_vm8, %v547_v43, %v985_v62  ;;  %v553_v3 = vsel %vm269_vm8, %v985_v62, %v986_v61  ;;  %900 = vmatpush1.bf16.msk.msra.mxu1 %vm1124_vm7, %v898_v58  ;;  %vm1318_vm4 = vmpackc.low %vm1106_vm3, %vm1135_vm10 }
 0x2a2   : > { %v901_v4 = vpack.c.bf16 %v573_v1, %v553_v3  ;;  %v904_v5 = vpack.c.bf16 %v572_v63, %v552_v2  ;;  %v591_v6 = vpop.permute.xlu0 %590  ;;  %v994_v7 = vpop.permute.xlu1 %993  ;;  %vm1320_vm3 = vmmov %vm1319_vm1 }
 0x2a3   : > { %v996_v8 = vunpack.i.h.bf16 %v994_v7  ;;  %v995_v9 = vunpack.i.l.bf16 %v994_v7 }
 0x2a4   : > { %903 = vmatprep.subr.msk.bf16.mxu1 %vm878_vm11, %v901_v4 }
 0x2a5   : > { %v596_v10 = vsel %vm1316_vm0, %v591_v6, %v995_v9  ;;  %v597_v11 = vsel %vm1317_vm2, %v995_v9, %v996_v8  ;;  %906 = vmatpush1.bf16.msk.msra.mxu1 %vm1318_vm4, %v904_v5 }
 0x2a6   : > { %v907_v12 = vpack.c.bf16 %v597_v11, %v1212_v36  ;;  %v910_v13 = vpack.c.bf16 %v596_v10, %v1210_v35  ;;  %v1004_v14 = vpop.permute.xlu0 %1003  ;;  %v999_v17 = vpop.permute.xlu1 %998 }
 0x2a7   : > { %v1006_v15 = vunpack.i.h.bf16 %v1004_v14  ;;  %v1005_v16 = vunpack.i.l.bf16 %v1004_v14  ;;  %v1001_v19 = vunpack.i.h.bf16 %v999_v17  ;;  %v1000_v20 = vunpack.i.l.bf16 %v999_v17 }
 0x2a8   : > { %909 = vmatprep.subr.msk.bf16.mxu1 %vm1167_vm15, %v907_v12 }
 0x2a9   : > { %v637_v21 = vsel %vm357_vm14, %v1005_v16, %v1006_v15  ;;  %v617_v18 = vsel %vm1319_vm1, %v1000_v20, %v1001_v19  ;;  %912 = vmatpush1.bf16.msk.msra.mxu1 %vm1176_vm12, %v910_v13 }
 0x2aa   : > { %v913_v22 = vpack.c.bf16 %v637_v21, %v617_v18  ;;  %v631_v23 = vpop.permute.xlu0 %630  ;;  %v611_v24 = vpop.permute.xlu1 %610 }
 0x2ab   : > { %v636_v25 = vsel %vm357_vm14, %v631_v23, %v1005_v16  ;;  %v616_v27 = vsel %vm1320_vm3, %v611_v24, %v1000_v20 }
 0x2ac   : > { %v916_v28 = vpack.c.bf16 %v636_v25, %v616_v27  ;;  %915 = vmatprep.subr.msk.bf16.mxu1 %vm1115_vm6, %v913_v22 }
 0x2ae   : > { %v653_v53 = vpop.permute.xlu0 %652  ;;  %v651_v29 = vpop.permute.xlu1 %650  ;;  %918 = vmatpush1.bf16.msk.msra.mxu1 %vm1124_vm7, %v916_v28 }
 0x2af   : > { %v655_v30 = vsel %vm376_vm5, %v651_v29, %v653_v53 }
 0x2b0   : > { %869 = vmatprep.subr.msk.mxu1 %vm1128_vm9, %v655_v30 }
 0x2b2   : > { %v649_v57 = vpop.permute.xlu1 %648 }
 0x2b3   : > { %v654_v34 = vsel %vm376_vm5, %v649_v57, %v651_v29 }
 0x2b4   : > { %870 = vmatpush1.msk.msra.mxu1 %vm1135_vm10, %v654_v34 }
 0x2b5   : > { %842 = vmatmul.mubr.msk.f32.vlgmr.msra.gmra.mrb[0].mxu1 %vm403_vm13, %v499_v31 }
 0x388   : > { %v749_v26 = vpop.f32.mrb[0].mxu1 }
 0x389   : > { %v751_v32 = vpop.f32.mrb[1].mxu1  ;;  %v758_v35 = vmul.f32 %v749_v26, %v749_v26 }
 0x38a   : > { %v759_v36 = vmul.f32 %v751_v32, %v751_v32  ;;  %v754_v37 = vadd.f32 %v751_v32, %v749_v26 }
 0x38c   : > { %755 = vadd.xlane.f32.xlu0 %v754_v37  ;;  %v760_v33 = vadd.f32 %v759_v36, %v758_v35 }
 0x38e   : > { %761 = vadd.xlane.f32.xlu1 %v760_v33 }
 0x419   : > { %v756_v39 = vpop.xlane.xlu0 %755 }
 0x41a   : > { %v757_v40 = vmul.f32 0.00390625, %v756_v39 }
 0x41b   : > { %v762_v41 = vpop.xlane.xlu1 %761 }
 0x41c   : > { %v763_v42 = vmul.f32 0.00390625, %v762_v41  ;;  %v764_v43 = vmul.f32 %v757_v40, %v757_v40  ;;  %v767_v46 = vsub.f32 %v749_v26, %v757_v40  ;;  %v768_v47 = vsub.f32 %v751_v32, %v757_v40 }
 0x41e   : > { %v765_v44 = vsub.f32 %v763_v42, %v764_v43 }
 0x420   : > { %v766_v45 = vmax.f32 %v765_v44, 0.0 }
 0x422   : > { %v769_v38 = vadd.f32 1e-05, %v766_v45 }
 0x424   : > { %1009 = vrsqrt.f32 %v769_v38 }
 0x42e   : > { %v1010_v48 = vpop.eup %1009 }
 0x42f   : > { %v771_v49 = vmul.f32 %v1010_v48, %v767_v46  ;;  %v772_v50 = vmul.f32 %v1010_v48, %v768_v47 }
 0x431   : > { %v773_v51 = vmax.f32 %v771_v49, 0.0  ;;  %v774_v52 = vmax.f32 %v772_v50, 0.0 }
 0x433   : > { %775 = vst [vmem:[%s170_s5] sm:$0xff] %v773_v51  ;;  %776 = vst [vmem:[%s170_s5 + $0x8] sm:$0xff] %v774_v52 }
 0x434 PF: > { %s13_s12 = sadd.s32 1, %s1017_s12  }
 0x435   : > { %p10_p4 = scmp.ge.s32.totalorder %s13_s12, 4  }
 0x437   :  { %12 = sbr.rel (!%p10_p4) target bundleno = 1 (0x1), region = 62 }

</bundles_post_ra>
